<compile_context>
chip_gen: v7x
topology: tpu7x:2x2x1
jax: 0.10.0
libtpu: 0.0.40
codegen_flags: <defaults>
</compile_context>

<pallas_src>
import functools

import jax
import jax.numpy as jnp
from jax import lax
from jax.experimental import pallas as pl
from jax.experimental.pallas import tpu as pltpu

_PREC = lax.Precision.HIGHEST


# ----------------------------------------------------------------------------
# Pallas kernel: one (direction, time-chunk) block of a bidirectional LSTM
# ----------------------------------------------------------------------------
def _bilstm_chunk_kernel(gx_ref, whh_ref, out_ref, h_sc, c_sc):
    """gx_ref : (Tc, B, 4H)  precomputed x @ W_ih + b_ih + b_hh for this block
    whh_ref: (H, 4H)      recurrent weights for this direction
    out_ref: (Tc, B, H)   hidden states (placed at original time positions)
    h_sc/c_sc: (B, H) f32 recurrent state carried across time chunks
    """
    H = whh_ref.shape[0]
    Tc = out_ref.shape[0]
    is_rev = pl.program_id(0) == 1

    @pl.when(pl.program_id(1) == 0)
    def _():
        h_sc[...] = jnp.zeros_like(h_sc)
        c_sc[...] = jnp.zeros_like(c_sc)

    whh = whh_ref[...]  # (H, 4H), loop-invariant

    # sigmoid(x) = 0.5*tanh(0.5x)+0.5: one tanh over the whole 4H gate row
    # covers i, f, o (scale 0.5, shift 0.5) and g (scale 1.0, shift 0.0) in a
    # single EUP op.
    col = lax.broadcasted_iota(jnp.int32, (1, 4 * H), 1)
    is_g = jnp.logical_and(col >= 2 * H, col < 3 * H)
    scale = jnp.where(is_g, 1.0, 0.5).astype(jnp.float32)
    shift = jnp.where(is_g, 0.0, 0.5).astype(jnp.float32)

    # forward direction walks local time 0..Tc-1, reverse walks Tc-1..0;
    # pure scalar-unit address math, hidden under the matmul.
    base = jnp.where(is_rev, Tc - 1, 0)
    sgn = jnp.where(is_rev, -1, 1)

    def step(s, carry):
        h, c = carry
        lt = base + sgn * s
        gates = gx_ref[lt] + jnp.dot(h, whh, preferred_element_type=jnp.float32)
        act = jnp.tanh(gates * scale) * scale + shift        # (B, 4H)
        i = act[:, 0:H]
        f = act[:, H:2 * H]
        g = act[:, 2 * H:3 * H]
        o = act[:, 3 * H:4 * H]
        c_new = f * c + i * g
        h_new = o * jnp.tanh(c_new)
        out_ref[lt] = h_new.astype(out_ref.dtype)
        return h_new, c_new

    h_fin, c_fin = lax.fori_loop(0, Tc, step, (h_sc[...], c_sc[...]),
                                 unroll=True)
    h_sc[...] = h_fin
    c_sc[...] = c_fin


def _bidir_lstm_layer(gx, w_hh, *, time_chunk):
    """gx: (2, T, B, 4H), w_hh: (2, H, 4H) -> hidden states (2, T, B, H)."""
    _, T, B, G = gx.shape
    H = G // 4
    Tc = time_chunk
    assert T % Tc == 0
    nTc = T // Tc

    # direction 0 walks time chunks forward, direction 1 walks them backward
    def tmap(d, t):
        return (d, t + d * (nTc - 1 - 2 * t), 0, 0)

    return pl.pallas_call(
        _bilstm_chunk_kernel,
        out_shape=jax.ShapeDtypeStruct((2, T, B, H), gx.dtype),
        grid_spec=pltpu.PrefetchScalarGridSpec(
            num_scalar_prefetch=0,
            grid=(2, nTc),
            in_specs=[
                pl.BlockSpec((None, Tc, B, 4 * H), tmap),
                pl.BlockSpec((None, H, 4 * H), lambda d, t: (d, 0, 0)),
            ],
            out_specs=pl.BlockSpec((None, Tc, B, H), tmap),
            scratch_shapes=[
                pltpu.VMEM((B, H), jnp.float32),
                pltpu.VMEM((B, H), jnp.float32),
            ],
        ),
        compiler_params=pltpu.CompilerParams(
            dimension_semantics=("parallel", "arbitrary"),
            vmem_limit_bytes=32 * 1024 * 1024,
        ),
    )(gx, w_hh)


def _pick_time_chunk(T, cap=32):
    """Largest divisor of T not exceeding `cap` (chunk must divide T exactly:
    zero-padding time would corrupt the reverse-direction recurrence)."""
    for c in range(min(cap, T), 0, -1):
        if T % c == 0:
            return c
    return 1


# ----------------------------------------------------------------------------
# Model: parameter init + forward
# ----------------------------------------------------------------------------
def init_params(key, feature_dim, hidden_dim, n_lstm_layers):
    """PyTorch-style LSTM/Linear init; weights stored pre-transposed & stacked
    per direction (gate order i, f, g, o; b_ih + b_hh folded together)."""
    H = hidden_dim
    params = {}
    k = 1.0 / float(hidden_dim) ** 0.5
    for layer in range(n_lstm_layers):
        din = feature_dim if layer == 0 else 2 * H
        wih_t, whh_t, bias = [], [], []
        for _ in range(2):  # fwd, rev
            key, k1, k2, k3, k4 = jax.random.split(key, 5)
            w_ih = jax.random.uniform(k1, (4 * H, din), jnp.float32, -k, k)
            w_hh = jax.random.uniform(k2, (4 * H, H), jnp.float32, -k, k)
            b_ih = jax.random.uniform(k3, (4 * H,), jnp.float32, -k, k)
            b_hh = jax.random.uniform(k4, (4 * H,), jnp.float32, -k, k)
            wih_t.append(w_ih.T)        # (Din, 4H)
            whh_t.append(w_hh.T)        # (H, 4H)
            bias.append(b_ih + b_hh)    # (4H,)
        w_ih_s = jnp.stack(wih_t)       # (2, Din, 4H)
        if layer > 0:                   # split input-direction dim for einsum
            w_ih_s = w_ih_s.reshape(2, 2, H, 4 * H)
        params[f"l{layer}"] = (w_ih_s, jnp.stack(whh_t), jnp.stack(bias))

    ko = 1.0 / float(2 * hidden_dim) ** 0.5
    key, k1, k2 = jax.random.split(key, 3)
    w_out = jax.random.uniform(k1, (2, 2 * H), jnp.float32, -ko, ko)
    b_out = jax.random.uniform(k2, (2,), jnp.float32, -ko, ko)
    params["out"] = (w_out.T.reshape(2, H, 2), b_out)   # (dir, H, 2), (2,)
    return params


@functools.partial(jax.jit, static_argnums=(2, 3))
def lstm_model_forward(x, params, hidden_dim, n_lstm_layers):
    """x: (B, T, feature_dim) -> (B, T, 2).  Matches LSTMModel.forward."""
    # TODO(synk): nn.Dropout(p=0.5) is stochastic in training; eval-mode identity here.
    B, T, _ = x.shape
    H = hidden_dim
    Bp = max(8, -(-B // 8) * 8)          # pad batch to f32 sublane width
    Tc = _pick_time_chunk(T)

    x_tm = jnp.transpose(x, (1, 0, 2))   # time-major (T, B, F)
    if Bp != B:
        x_tm = jnp.pad(x_tm, ((0, 0), (0, Bp - B), (0, 0)))

    h = None
    for layer in range(n_lstm_layers):
        w_ih, w_hh, b = params[f"l{layer}"]
        # hoisted input projection for both directions: one big MXU GEMM (XLA)
        if layer == 0:
            gx = jnp.einsum("tbf,cfg->ctbg", x_tm, w_ih, precision=_PREC)
        else:
            gx = jnp.einsum("etbh,cehg->ctbg", h, w_ih, precision=_PREC)
        gx = gx + b[:, None, None, :]                    # (2, T, Bp, 4H)
        h = _bidir_lstm_layer(gx, w_hh, time_chunk=Tc)   # (2, T, Bp, H)

    # final Linear(2H -> 2) left to XLA; contracts over (direction, H) so the
    # fwd/rev concat is never materialized.
    w_out, b_out = params["out"]
    logits = jnp.einsum("etbh,eho->tbo", h, w_out, precision=_PREC) + b_out
    return jnp.transpose(logits, (1, 0, 2))[:B]          # (B, T, 2)


# ----------------------------------------------------------------------------
# Pure-JAX reference (lax.scan) for correctness checking
# ----------------------------------------------------------------------------
def _ref_direction(x_tm, w_ih_t, w_hh_t, b, reverse):
    T, B, _ = x_tm.shape
    H = w_hh_t.shape[0]

    def step(carry, x_t):
        h, c = carry
        gates = (jnp.dot(x_t, w_ih_t, precision=_PREC)
                 + jnp.dot(h, w_hh_t, precision=_PREC) + b)
        i, f, g, o = jnp.split(gates, 4, axis=-1)
        i, f, o = jax.nn.sigmoid(i), jax.nn.sigmoid(f), jax.nn.sigmoid(o)
        g = jnp.tanh(g)
        c = f * c + i * g
        h = o * jnp.tanh(c)
        return (h, c), h

    xs = x_tm[::-1] if reverse else x_tm
    zeros = jnp.zeros((B, H), jnp.float32)
    _, hs = lax.scan(step, (zeros, zeros), xs)
    return hs[::-1] if reverse else hs


def _ref_forward(x, params, hidden_dim, n_lstm_layers):
    H = hidden_dim
    h = jnp.transpose(x, (1, 0, 2))
    for layer in range(n_lstm_layers):
        w_ih, w_hh, b = params[f"l{layer}"]
        if layer > 0:
            w_ih = w_ih.reshape(2, 2 * H, 4 * H)
        fwd = _ref_direction(h, w_ih[0], w_hh[0], b[0], reverse=False)
        rev = _ref_direction(h, w_ih[1], w_hh[1], b[1], reverse=True)
        h = jnp.concatenate([fwd, rev], axis=-1)
    w_out, b_out = params["out"]
    out = jnp.dot(h, w_out.reshape(2 * H, 2), precision=_PREC) + b_out
    return jnp.transpose(out, (1, 0, 2))


# ----------------------------------------------------------------------------
if __name__ == "__main__":
    B, T, FEATURE_DIM, HIDDEN_DIM, N_LAYERS = 2, 8, 16, 32, 2

    key = jax.random.PRNGKey(0)
    key, pkey, xkey = jax.random.split(key, 3)
    params = init_params(pkey, FEATURE_DIM, HIDDEN_DIM, N_LAYERS)
    x = jax.random.normal(xkey, (B, T, FEATURE_DIM), jnp.float32)

    out = lstm_model_forward(x, params, HIDDEN_DIM, N_LAYERS)
    out = jax.block_until_ready(out)
    assert out.shape == (B, T, 2), out.shape

    ref = _ref_forward(x, params, HIDDEN_DIM, N_LAYERS)
    max_err = float(jnp.max(jnp.abs(out - ref)))
    assert jnp.allclose(out, ref, rtol=5e-4, atol=5e-4), (
        f"mismatch vs pure-JAX reference: max abs err {max_err}")

    print("KERNEL_OK")
</pallas_src>

<mosaic_0001>
module attributes {stable_mosaic.version = 11 : i64} {
  func.func @_bilstm_chunk_kernel(%arg0: i32, %arg1: i32, %arg2: memref<1x8x8x128xf32, #tpu.memory_space<vmem>>, %arg3: memref<1x32x128xf32, #tpu.memory_space<vmem>>, %arg4: memref<1x8x8x32xf32, #tpu.memory_space<vmem>>, %arg5: memref<8x32xf32, #tpu.memory_space<vmem>>, %arg6: memref<8x32xf32, #tpu.memory_space<vmem>>) attributes {dimension_semantics = [#tpu.dimension_semantics<parallel>, #tpu.dimension_semantics<arbitrary>], iteration_bounds = array<i64: 2, 1>, scalar_prefetch = 0 : i64, scratch_operands = 2 : i64, tpu.core_type = #tpu.core_type<tc>, window_params = [{transform_indices = @transform_0, window_bounds = array<i64: 1, 8, 8, 128>}, {transform_indices = @transform_1, window_bounds = array<i64: 1, 32, 128>}, {transform_indices = @transform_2, window_bounds = array<i64: 1, 8, 8, 32>}]} {
    %c1_i32 = arith.constant 1 : i32
    %0 = arith.cmpi eq, %arg0, %c1_i32 : i32
    %c0_i32 = arith.constant 0 : i32
    %1 = arith.cmpi eq, %arg1, %c0_i32 : i32
    %2 = arith.extui %1 : i1 to i32
    %c0_i32_0 = arith.constant 0 : i32
    %3 = arith.cmpi ne, %2, %c0_i32_0 : i32
    scf.if %3 {
      %cst_75 = arith.constant 0.000000e+00 : f32
      %240 = vector.broadcast %cst_75 : f32 to vector<8x32xf32>
      %c0_76 = arith.constant 0 : index
      %c0_77 = arith.constant 0 : index
      %241 = vector.load %arg5[%c0_76, %c0_77] : memref<8x32xf32, #tpu.memory_space<vmem>>, vector<8x32xf32>
      tpu.vector_store %arg5[%c0_76, %c0_77], %240 {strides = array<i32>} : memref<8x32xf32, #tpu.memory_space<vmem>>, vector<8x32xf32>,
      %cst_78 = arith.constant 0.000000e+00 : f32
      %242 = vector.broadcast %cst_78 : f32 to vector<8x32xf32>
      %c0_79 = arith.constant 0 : index
      %c0_80 = arith.constant 0 : index
      %243 = vector.load %arg6[%c0_79, %c0_80] : memref<8x32xf32, #tpu.memory_space<vmem>>, vector<8x32xf32>
      tpu.vector_store %arg6[%c0_79, %c0_80], %242 {strides = array<i32>} : memref<8x32xf32, #tpu.memory_space<vmem>>, vector<8x32xf32>,
    } else {
    }
    %c0 = arith.constant 0 : index
    %c0_1 = arith.constant 0 : index
    %c0_2 = arith.constant 0 : index
    %4 = vector.load %arg3[%c0, %c0_1, %c0_2] : memref<1x32x128xf32, #tpu.memory_space<vmem>>, vector<1x32x128xf32>
    %5 = vector.shape_cast %4 : vector<1x32x128xf32> to vector<32x128xf32>
    %6 = tpu.iota {dimensions = array<i32: 1>} : vector<1x128xi32>
    %c64_i32 = arith.constant 64 : i32
    %7 = vector.broadcast %c64_i32 : i32 to vector<1x128xi32>
    %8 = arith.cmpi sge, %6, %7 : vector<1x128xi32>
    %c96_i32 = arith.constant 96 : i32
    %9 = vector.broadcast %c96_i32 : i32 to vector<1x128xi32>
    %10 = arith.cmpi slt, %6, %9 : vector<1x128xi32>
    %11 = arith.andi %8, %10 : vector<1x128xi1>
    %cst = arith.constant 1.000000e+00 : f32
    %cst_3 = arith.constant 5.000000e-01 : f32
    %12 = vector.broadcast %cst : f32 to vector<1x128xf32>
    %13 = vector.broadcast %cst_3 : f32 to vector<1x128xf32>
    %14 = arith.select %11, %12, %13 : vector<1x128xi1>, vector<1x128xf32>
    %cst_4 = arith.constant 0.000000e+00 : f32
    %cst_5 = arith.constant 5.000000e-01 : f32
    %15 = vector.broadcast %cst_4 : f32 to vector<1x128xf32>
    %16 = vector.broadcast %cst_5 : f32 to vector<1x128xf32>
    %17 = arith.select %11, %15, %16 : vector<1x128xi1>, vector<1x128xf32>
    %c7_i32 = arith.constant 7 : i32
    %c0_i32_6 = arith.constant 0 : i32
    %18 = arith.select %0, %c7_i32, %c0_i32_6 : i32
    %c-1_i32 = arith.constant -1 : i32
    %c1_i32_7 = arith.constant 1 : i32
    %19 = arith.select %0, %c-1_i32, %c1_i32_7 : i32
    %c0_8 = arith.constant 0 : index
    %c0_9 = arith.constant 0 : index
    %20 = vector.load %arg5[%c0_8, %c0_9] : memref<8x32xf32, #tpu.memory_space<vmem>>, vector<8x32xf32>
    %c0_10 = arith.constant 0 : index
    %c0_11 = arith.constant 0 : index
    %21 = vector.load %arg6[%c0_10, %c0_11] : memref<8x32xf32, #tpu.memory_space<vmem>>, vector<8x32xf32>
    %c0_i32_12 = arith.constant 0 : i32
    %22 = arith.muli %19, %c0_i32_12 : i32
    %23 = arith.addi %18, %22 : i32
    %c0_13 = arith.constant 0 : index
    %24 = arith.index_cast %23 : i32 to index
    %c0_14 = arith.constant 0 : index
    %c0_15 = arith.constant 0 : index
    %25 = vector.load %arg2[%c0_13, %24, %c0_14, %c0_15] : memref<1x8x8x128xf32, #tpu.memory_space<vmem>>, vector<1x1x8x128xf32>
    %26 = vector.shape_cast %25 : vector<1x1x8x128xf32> to vector<8x128xf32>
    %cst_16 = arith.constant dense<0.000000e+00> : vector<8x128xf32>
    %27 = tpu.matmul %20, %5, %cst_16 {dimension_numbers = #tpu.dot_dimension_numbers<[1], [0], [0], [1], [0, 0, 1, 1], [], []>} : vector<8x32xf32>, vector<32x128xf32>, vector<8x128xf32> -> vector<8x128xf32>
    %28 = arith.addf %26, %27 : vector<8x128xf32>
    %29 = vector.broadcast %14 : vector<1x128xf32> to vector<8x128xf32>
    %30 = arith.mulf %28, %29 : vector<8x128xf32>
    %31 = math.tanh %30 : vector<8x128xf32>
    %32 = vector.broadcast %14 : vector<1x128xf32> to vector<8x128xf32>
    %33 = arith.mulf %31, %32 : vector<8x128xf32>
    %34 = vector.broadcast %17 : vector<1x128xf32> to vector<8x128xf32>
    %35 = arith.addf %33, %34 : vector<8x128xf32>
    %36 = vector.extract_strided_slice %35 {offsets = [0, 0], sizes = [8, 32], strides = [1, 1]} : vector<8x128xf32> to vector<8x32xf32>
    %37 = vector.extract_strided_slice %35 {offsets = [0, 32], sizes = [8, 32], strides = [1, 1]} : vector<8x128xf32> to vector<8x32xf32>
    %38 = vector.extract_strided_slice %35 {offsets = [0, 64], sizes = [8, 32], strides = [1, 1]} : vector<8x128xf32> to vector<8x32xf32>
    %39 = vector.extract_strided_slice %35 {offsets = [0, 96], sizes = [8, 32], strides = [1, 1]} : vector<8x128xf32> to vector<8x32xf32>
    %40 = arith.mulf %37, %21 : vector<8x32xf32>
    %41 = arith.mulf %36, %38 : vector<8x32xf32>
    %42 = arith.addf %40, %41 : vector<8x32xf32>
    %43 = math.tanh %42 : vector<8x32xf32>
    %44 = arith.mulf %39, %43 : vector<8x32xf32>
    %c0_17 = arith.constant 0 : index
    %45 = arith.index_cast %23 : i32 to index
    %c0_18 = arith.constant 0 : index
    %c0_19 = arith.constant 0 : index
    %46 = vector.load %arg4[%c0_17, %45, %c0_18, %c0_19] : memref<1x8x8x32xf32, #tpu.memory_space<vmem>>, vector<1x1x8x32xf32>
    %47 = vector.shape_cast %46 : vector<1x1x8x32xf32> to vector<8x32xf32>
    %48 = vector.shape_cast %44 : vector<8x32xf32> to vector<1x1x8x32xf32>
    tpu.vector_store %arg4[%c0_17, %45, %c0_18, %c0_19], %48 {strides = array<i32>} : memref<1x8x8x32xf32, #tpu.memory_space<vmem>>, vector<1x1x8x32xf32>,
    %c1_i32_20 = arith.constant 1 : i32
    %49 = arith.muli %19, %c1_i32_20 : i32
    %50 = arith.addi %18, %49 : i32
    %c0_21 = arith.constant 0 : index
    %51 = arith.index_cast %50 : i32 to index
    %c0_22 = arith.constant 0 : index
    %c0_23 = arith.constant 0 : index
    %52 = vector.load %arg2[%c0_21, %51, %c0_22, %c0_23] : memref<1x8x8x128xf32, #tpu.memory_space<vmem>>, vector<1x1x8x128xf32>
    %53 = vector.shape_cast %52 : vector<1x1x8x128xf32> to vector<8x128xf32>
    %cst_24 = arith.constant dense<0.000000e+00> : vector<8x128xf32>
    %54 = tpu.matmul %44, %5, %cst_24 {dimension_numbers = #tpu.dot_dimension_numbers<[1], [0], [0], [1], [0, 0, 1, 1], [], []>} : vector<8x32xf32>, vector<32x128xf32>, vector<8x128xf32> -> vector<8x128xf32>
    %55 = arith.addf %53, %54 : vector<8x128xf32>
    %56 = vector.broadcast %14 : vector<1x128xf32> to vector<8x128xf32>
    %57 = arith.mulf %55, %56 : vector<8x128xf32>
    %58 = math.tanh %57 : vector<8x128xf32>
    %59 = vector.broadcast %14 : vector<1x128xf32> to vector<8x128xf32>
    %60 = arith.mulf %58, %59 : vector<8x128xf32>
    %61 = vector.broadcast %17 : vector<1x128xf32> to vector<8x128xf32>
    %62 = arith.addf %60, %61 : vector<8x128xf32>
    %63 = vector.extract_strided_slice %62 {offsets = [0, 0], sizes = [8, 32], strides = [1, 1]} : vector<8x128xf32> to vector<8x32xf32>
    %64 = vector.extract_strided_slice %62 {offsets = [0, 32], sizes = [8, 32], strides = [1, 1]} : vector<8x128xf32> to vector<8x32xf32>
    %65 = vector.extract_strided_slice %62 {offsets = [0, 64], sizes = [8, 32], strides = [1, 1]} : vector<8x128xf32> to vector<8x32xf32>
    %66 = vector.extract_strided_slice %62 {offsets = [0, 96], sizes = [8, 32], strides = [1, 1]} : vector<8x128xf32> to vector<8x32xf32>
    %67 = arith.mulf %64, %42 : vector<8x32xf32>
    %68 = arith.mulf %63, %65 : vector<8x32xf32>
    %69 = arith.addf %67, %68 : vector<8x32xf32>
    %70 = math.tanh %69 : vector<8x32xf32>
    %71 = arith.mulf %66, %70 : vector<8x32xf32>
    %c0_25 = arith.constant 0 : index
    %72 = arith.index_cast %50 : i32 to index
    %c0_26 = arith.constant 0 : index
    %c0_27 = arith.constant 0 : index
    %73 = vector.load %arg4[%c0_25, %72, %c0_26, %c0_27] : memref<1x8x8x32xf32, #tpu.memory_space<vmem>>, vector<1x1x8x32xf32>
    %74 = vector.shape_cast %73 : vector<1x1x8x32xf32> to vector<8x32xf32>
    %75 = vector.shape_cast %71 : vector<8x32xf32> to vector<1x1x8x32xf32>
    tpu.vector_store %arg4[%c0_25, %72, %c0_26, %c0_27], %75 {strides = array<i32>} : memref<1x8x8x32xf32, #tpu.memory_space<vmem>>, vector<1x1x8x32xf32>,
    %c2_i32 = arith.constant 2 : i32
    %76 = arith.muli %19, %c2_i32 : i32
    %77 = arith.addi %18, %76 : i32
    %c0_28 = arith.constant 0 : index
    %78 = arith.index_cast %77 : i32 to index
    %c0_29 = arith.constant 0 : index
    %c0_30 = arith.constant 0 : index
    %79 = vector.load %arg2[%c0_28, %78, %c0_29, %c0_30] : memref<1x8x8x128xf32, #tpu.memory_space<vmem>>, vector<1x1x8x128xf32>
    %80 = vector.shape_cast %79 : vector<1x1x8x128xf32> to vector<8x128xf32>
    %cst_31 = arith.constant dense<0.000000e+00> : vector<8x128xf32>
    %81 = tpu.matmul %71, %5, %cst_31 {dimension_numbers = #tpu.dot_dimension_numbers<[1], [0], [0], [1], [0, 0, 1, 1], [], []>} : vector<8x32xf32>, vector<32x128xf32>, vector<8x128xf32> -> vector<8x128xf32>
    %82 = arith.addf %80, %81 : vector<8x128xf32>
    %83 = vector.broadcast %14 : vector<1x128xf32> to vector<8x128xf32>
    %84 = arith.mulf %82, %83 : vector<8x128xf32>
    %85 = math.tanh %84 : vector<8x128xf32>
    %86 = vector.broadcast %14 : vector<1x128xf32> to vector<8x128xf32>
    %87 = arith.mulf %85, %86 : vector<8x128xf32>
    %88 = vector.broadcast %17 : vector<1x128xf32> to vector<8x128xf32>
    %89 = arith.addf %87, %88 : vector<8x128xf32>
    %90 = vector.extract_strided_slice %89 {offsets = [0, 0], sizes = [8, 32], strides = [1, 1]} : vector<8x128xf32> to vector<8x32xf32>
    %91 = vector.extract_strided_slice %89 {offsets = [0, 32], sizes = [8, 32], strides = [1, 1]} : vector<8x128xf32> to vector<8x32xf32>
    %92 = vector.extract_strided_slice %89 {offsets = [0, 64], sizes = [8, 32], strides = [1, 1]} : vector<8x128xf32> to vector<8x32xf32>
    %93 = vector.extract_strided_slice %89 {offsets = [0, 96], sizes = [8, 32], strides = [1, 1]} : vector<8x128xf32> to vector<8x32xf32>
    %94 = arith.mulf %91, %69 : vector<8x32xf32>
    %95 = arith.mulf %90, %92 : vector<8x32xf32>
    %96 = arith.addf %94, %95 : vector<8x32xf32>
    %97 = math.tanh %96 : vector<8x32xf32>
    %98 = arith.mulf %93, %97 : vector<8x32xf32>
    %c0_32 = arith.constant 0 : index
    %99 = arith.index_cast %77 : i32 to index
    %c0_33 = arith.constant 0 : index
    %c0_34 = arith.constant 0 : index
    %100 = vector.load %arg4[%c0_32, %99, %c0_33, %c0_34] : memref<1x8x8x32xf32, #tpu.memory_space<vmem>>, vector<1x1x8x32xf32>
    %101 = vector.shape_cast %100 : vector<1x1x8x32xf32> to vector<8x32xf32>
    %102 = vector.shape_cast %98 : vector<8x32xf32> to vector<1x1x8x32xf32>
    tpu.vector_store %arg4[%c0_32, %99, %c0_33, %c0_34], %102 {strides = array<i32>} : memref<1x8x8x32xf32, #tpu.memory_space<vmem>>, vector<1x1x8x32xf32>,
    %c3_i32 = arith.constant 3 : i32
    %103 = arith.muli %19, %c3_i32 : i32
    %104 = arith.addi %18, %103 : i32
    %c0_35 = arith.constant 0 : index
    %105 = arith.index_cast %104 : i32 to index
    %c0_36 = arith.constant 0 : index
    %c0_37 = arith.constant 0 : index
    %106 = vector.load %arg2[%c0_35, %105, %c0_36, %c0_37] : memref<1x8x8x128xf32, #tpu.memory_space<vmem>>, vector<1x1x8x128xf32>
    %107 = vector.shape_cast %106 : vector<1x1x8x128xf32> to vector<8x128xf32>
    %cst_38 = arith.constant dense<0.000000e+00> : vector<8x128xf32>
    %108 = tpu.matmul %98, %5, %cst_38 {dimension_numbers = #tpu.dot_dimension_numbers<[1], [0], [0], [1], [0, 0, 1, 1], [], []>} : vector<8x32xf32>, vector<32x128xf32>, vector<8x128xf32> -> vector<8x128xf32>
    %109 = arith.addf %107, %108 : vector<8x128xf32>
    %110 = vector.broadcast %14 : vector<1x128xf32> to vector<8x128xf32>
    %111 = arith.mulf %109, %110 : vector<8x128xf32>
    %112 = math.tanh %111 : vector<8x128xf32>
    %113 = vector.broadcast %14 : vector<1x128xf32> to vector<8x128xf32>
    %114 = arith.mulf %112, %113 : vector<8x128xf32>
    %115 = vector.broadcast %17 : vector<1x128xf32> to vector<8x128xf32>
    %116 = arith.addf %114, %115 : vector<8x128xf32>
    %117 = vector.extract_strided_slice %116 {offsets = [0, 0], sizes = [8, 32], strides = [1, 1]} : vector<8x128xf32> to vector<8x32xf32>
    %118 = vector.extract_strided_slice %116 {offsets = [0, 32], sizes = [8, 32], strides = [1, 1]} : vector<8x128xf32> to vector<8x32xf32>
    %119 = vector.extract_strided_slice %116 {offsets = [0, 64], sizes = [8, 32], strides = [1, 1]} : vector<8x128xf32> to vector<8x32xf32>
    %120 = vector.extract_strided_slice %116 {offsets = [0, 96], sizes = [8, 32], strides = [1, 1]} : vector<8x128xf32> to vector<8x32xf32>
    %121 = arith.mulf %118, %96 : vector<8x32xf32>
    %122 = arith.mulf %117, %119 : vector<8x32xf32>
    %123 = arith.addf %121, %122 : vector<8x32xf32>
    %124 = math.tanh %123 : vector<8x32xf32>
    %125 = arith.mulf %120, %124 : vector<8x32xf32>
    %c0_39 = arith.constant 0 : index
    %126 = arith.index_cast %104 : i32 to index
    %c0_40 = arith.constant 0 : index
    %c0_41 = arith.constant 0 : index
    %127 = vector.load %arg4[%c0_39, %126, %c0_40, %c0_41] : memref<1x8x8x32xf32, #tpu.memory_space<vmem>>, vector<1x1x8x32xf32>
    %128 = vector.shape_cast %127 : vector<1x1x8x32xf32> to vector<8x32xf32>
    %129 = vector.shape_cast %125 : vector<8x32xf32> to vector<1x1x8x32xf32>
    tpu.vector_store %arg4[%c0_39, %126, %c0_40, %c0_41], %129 {strides = array<i32>} : memref<1x8x8x32xf32, #tpu.memory_space<vmem>>, vector<1x1x8x32xf32>,
    %c4_i32 = arith.constant 4 : i32
    %130 = arith.muli %19, %c4_i32 : i32
    %131 = arith.addi %18, %130 : i32
    %c0_42 = arith.constant 0 : index
    %132 = arith.index_cast %131 : i32 to index
    %c0_43 = arith.constant 0 : index
    %c0_44 = arith.constant 0 : index
    %133 = vector.load %arg2[%c0_42, %132, %c0_43, %c0_44] : memref<1x8x8x128xf32, #tpu.memory_space<vmem>>, vector<1x1x8x128xf32>
    %134 = vector.shape_cast %133 : vector<1x1x8x128xf32> to vector<8x128xf32>
    %cst_45 = arith.constant dense<0.000000e+00> : vector<8x128xf32>
    %135 = tpu.matmul %125, %5, %cst_45 {dimension_numbers = #tpu.dot_dimension_numbers<[1], [0], [0], [1], [0, 0, 1, 1], [], []>} : vector<8x32xf32>, vector<32x128xf32>, vector<8x128xf32> -> vector<8x128xf32>
    %136 = arith.addf %134, %135 : vector<8x128xf32>
    %137 = vector.broadcast %14 : vector<1x128xf32> to vector<8x128xf32>
    %138 = arith.mulf %136, %137 : vector<8x128xf32>
    %139 = math.tanh %138 : vector<8x128xf32>
    %140 = vector.broadcast %14 : vector<1x128xf32> to vector<8x128xf32>
    %141 = arith.mulf %139, %140 : vector<8x128xf32>
    %142 = vector.broadcast %17 : vector<1x128xf32> to vector<8x128xf32>
    %143 = arith.addf %141, %142 : vector<8x128xf32>
    %144 = vector.extract_strided_slice %143 {offsets = [0, 0], sizes = [8, 32], strides = [1, 1]} : vector<8x128xf32> to vector<8x32xf32>
    %145 = vector.extract_strided_slice %143 {offsets = [0, 32], sizes = [8, 32], strides = [1, 1]} : vector<8x128xf32> to vector<8x32xf32>
    %146 = vector.extract_strided_slice %143 {offsets = [0, 64], sizes = [8, 32], strides = [1, 1]} : vector<8x128xf32> to vector<8x32xf32>
    %147 = vector.extract_strided_slice %143 {offsets = [0, 96], sizes = [8, 32], strides = [1, 1]} : vector<8x128xf32> to vector<8x32xf32>
    %148 = arith.mulf %145, %123 : vector<8x32xf32>
    %149 = arith.mulf %144, %146 : vector<8x32xf32>
    %150 = arith.addf %148, %149 : vector<8x32xf32>
    %151 = math.tanh %150 : vector<8x32xf32>
    %152 = arith.mulf %147, %151 : vector<8x32xf32>
    %c0_46 = arith.constant 0 : index
    %153 = arith.index_cast %131 : i32 to index
    %c0_47 = arith.constant 0 : index
    %c0_48 = arith.constant 0 : index
    %154 = vector.load %arg4[%c0_46, %153, %c0_47, %c0_48] : memref<1x8x8x32xf32, #tpu.memory_space<vmem>>, vector<1x1x8x32xf32>
    %155 = vector.shape_cast %154 : vector<1x1x8x32xf32> to vector<8x32xf32>
    %156 = vector.shape_cast %152 : vector<8x32xf32> to vector<1x1x8x32xf32>
    tpu.vector_store %arg4[%c0_46, %153, %c0_47, %c0_48], %156 {strides = array<i32>} : memref<1x8x8x32xf32, #tpu.memory_space<vmem>>, vector<1x1x8x32xf32>,
    %c5_i32 = arith.constant 5 : i32
    %157 = arith.muli %19, %c5_i32 : i32
    %158 = arith.addi %18, %157 : i32
    %c0_49 = arith.constant 0 : index
    %159 = arith.index_cast %158 : i32 to index
    %c0_50 = arith.constant 0 : index
    %c0_51 = arith.constant 0 : index
    %160 = vector.load %arg2[%c0_49, %159, %c0_50, %c0_51] : memref<1x8x8x128xf32, #tpu.memory_space<vmem>>, vector<1x1x8x128xf32>
    %161 = vector.shape_cast %160 : vector<1x1x8x128xf32> to vector<8x128xf32>
    %cst_52 = arith.constant dense<0.000000e+00> : vector<8x128xf32>
    %162 = tpu.matmul %152, %5, %cst_52 {dimension_numbers = #tpu.dot_dimension_numbers<[1], [0], [0], [1], [0, 0, 1, 1], [], []>} : vector<8x32xf32>, vector<32x128xf32>, vector<8x128xf32> -> vector<8x128xf32>
    %163 = arith.addf %161, %162 : vector<8x128xf32>
    %164 = vector.broadcast %14 : vector<1x128xf32> to vector<8x128xf32>
    %165 = arith.mulf %163, %164 : vector<8x128xf32>
    %166 = math.tanh %165 : vector<8x128xf32>
    %167 = vector.broadcast %14 : vector<1x128xf32> to vector<8x128xf32>
    %168 = arith.mulf %166, %167 : vector<8x128xf32>
    %169 = vector.broadcast %17 : vector<1x128xf32> to vector<8x128xf32>
    %170 = arith.addf %168, %169 : vector<8x128xf32>
    %171 = vector.extract_strided_slice %170 {offsets = [0, 0], sizes = [8, 32], strides = [1, 1]} : vector<8x128xf32> to vector<8x32xf32>
    %172 = vector.extract_strided_slice %170 {offsets = [0, 32], sizes = [8, 32], strides = [1, 1]} : vector<8x128xf32> to vector<8x32xf32>
    %173 = vector.extract_strided_slice %170 {offsets = [0, 64], sizes = [8, 32], strides = [1, 1]} : vector<8x128xf32> to vector<8x32xf32>
    %174 = vector.extract_strided_slice %170 {offsets = [0, 96], sizes = [8, 32], strides = [1, 1]} : vector<8x128xf32> to vector<8x32xf32>
    %175 = arith.mulf %172, %150 : vector<8x32xf32>
    %176 = arith.mulf %171, %173 : vector<8x32xf32>
    %177 = arith.addf %175, %176 : vector<8x32xf32>
    %178 = math.tanh %177 : vector<8x32xf32>
    %179 = arith.mulf %174, %178 : vector<8x32xf32>
    %c0_53 = arith.constant 0 : index
    %180 = arith.index_cast %158 : i32 to index
    %c0_54 = arith.constant 0 : index
    %c0_55 = arith.constant 0 : index
    %181 = vector.load %arg4[%c0_53, %180, %c0_54, %c0_55] : memref<1x8x8x32xf32, #tpu.memory_space<vmem>>, vector<1x1x8x32xf32>
    %182 = vector.shape_cast %181 : vector<1x1x8x32xf32> to vector<8x32xf32>
    %183 = vector.shape_cast %179 : vector<8x32xf32> to vector<1x1x8x32xf32>
    tpu.vector_store %arg4[%c0_53, %180, %c0_54, %c0_55], %183 {strides = array<i32>} : memref<1x8x8x32xf32, #tpu.memory_space<vmem>>, vector<1x1x8x32xf32>,
    %c6_i32 = arith.constant 6 : i32
    %184 = arith.muli %19, %c6_i32 : i32
    %185 = arith.addi %18, %184 : i32
    %c0_56 = arith.constant 0 : index
    %186 = arith.index_cast %185 : i32 to index
    %c0_57 = arith.constant 0 : index
    %c0_58 = arith.constant 0 : index
    %187 = vector.load %arg2[%c0_56, %186, %c0_57, %c0_58] : memref<1x8x8x128xf32, #tpu.memory_space<vmem>>, vector<1x1x8x128xf32>
    %188 = vector.shape_cast %187 : vector<1x1x8x128xf32> to vector<8x128xf32>
    %cst_59 = arith.constant dense<0.000000e+00> : vector<8x128xf32>
    %189 = tpu.matmul %179, %5, %cst_59 {dimension_numbers = #tpu.dot_dimension_numbers<[1], [0], [0], [1], [0, 0, 1, 1], [], []>} : vector<8x32xf32>, vector<32x128xf32>, vector<8x128xf32> -> vector<8x128xf32>
    %190 = arith.addf %188, %189 : vector<8x128xf32>
    %191 = vector.broadcast %14 : vector<1x128xf32> to vector<8x128xf32>
    %192 = arith.mulf %190, %191 : vector<8x128xf32>
    %193 = math.tanh %192 : vector<8x128xf32>
    %194 = vector.broadcast %14 : vector<1x128xf32> to vector<8x128xf32>
    %195 = arith.mulf %193, %194 : vector<8x128xf32>
    %196 = vector.broadcast %17 : vector<1x128xf32> to vector<8x128xf32>
    %197 = arith.addf %195, %196 : vector<8x128xf32>
    %198 = vector.extract_strided_slice %197 {offsets = [0, 0], sizes = [8, 32], strides = [1, 1]} : vector<8x128xf32> to vector<8x32xf32>
    %199 = vector.extract_strided_slice %197 {offsets = [0, 32], sizes = [8, 32], strides = [1, 1]} : vector<8x128xf32> to vector<8x32xf32>
    %200 = vector.extract_strided_slice %197 {offsets = [0, 64], sizes = [8, 32], strides = [1, 1]} : vector<8x128xf32> to vector<8x32xf32>
    %201 = vector.extract_strided_slice %197 {offsets = [0, 96], sizes = [8, 32], strides = [1, 1]} : vector<8x128xf32> to vector<8x32xf32>
    %202 = arith.mulf %199, %177 : vector<8x32xf32>
    %203 = arith.mulf %198, %200 : vector<8x32xf32>
    %204 = arith.addf %202, %203 : vector<8x32xf32>
    %205 = math.tanh %204 : vector<8x32xf32>
    %206 = arith.mulf %201, %205 : vector<8x32xf32>
    %c0_60 = arith.constant 0 : index
    %207 = arith.index_cast %185 : i32 to index
    %c0_61 = arith.constant 0 : index
    %c0_62 = arith.constant 0 : index
    %208 = vector.load %arg4[%c0_60, %207, %c0_61, %c0_62] : memref<1x8x8x32xf32, #tpu.memory_space<vmem>>, vector<1x1x8x32xf32>
    %209 = vector.shape_cast %208 : vector<1x1x8x32xf32> to vector<8x32xf32>
    %210 = vector.shape_cast %206 : vector<8x32xf32> to vector<1x1x8x32xf32>
    tpu.vector_store %arg4[%c0_60, %207, %c0_61, %c0_62], %210 {strides = array<i32>} : memref<1x8x8x32xf32, #tpu.memory_space<vmem>>, vector<1x1x8x32xf32>,
    %c7_i32_63 = arith.constant 7 : i32
    %211 = arith.muli %19, %c7_i32_63 : i32
    %212 = arith.addi %18, %211 : i32
    %c0_64 = arith.constant 0 : index
    %213 = arith.index_cast %212 : i32 to index
    %c0_65 = arith.constant 0 : index
    %c0_66 = arith.constant 0 : index
    %214 = vector.load %arg2[%c0_64, %213, %c0_65, %c0_66] : memref<1x8x8x128xf32, #tpu.memory_space<vmem>>, vector<1x1x8x128xf32>
    %215 = vector.shape_cast %214 : vector<1x1x8x128xf32> to vector<8x128xf32>
    %cst_67 = arith.constant dense<0.000000e+00> : vector<8x128xf32>
    %216 = tpu.matmul %206, %5, %cst_67 {dimension_numbers = #tpu.dot_dimension_numbers<[1], [0], [0], [1], [0, 0, 1, 1], [], []>} : vector<8x32xf32>, vector<32x128xf32>, vector<8x128xf32> -> vector<8x128xf32>
    %217 = arith.addf %215, %216 : vector<8x128xf32>
    %218 = vector.broadcast %14 : vector<1x128xf32> to vector<8x128xf32>
    %219 = arith.mulf %217, %218 : vector<8x128xf32>
    %220 = math.tanh %219 : vector<8x128xf32>
    %221 = vector.broadcast %14 : vector<1x128xf32> to vector<8x128xf32>
    %222 = arith.mulf %220, %221 : vector<8x128xf32>
    %223 = vector.broadcast %17 : vector<1x128xf32> to vector<8x128xf32>
    %224 = arith.addf %222, %223 : vector<8x128xf32>
    %225 = vector.extract_strided_slice %224 {offsets = [0, 0], sizes = [8, 32], strides = [1, 1]} : vector<8x128xf32> to vector<8x32xf32>
    %226 = vector.extract_strided_slice %224 {offsets = [0, 32], sizes = [8, 32], strides = [1, 1]} : vector<8x128xf32> to vector<8x32xf32>
    %227 = vector.extract_strided_slice %224 {offsets = [0, 64], sizes = [8, 32], strides = [1, 1]} : vector<8x128xf32> to vector<8x32xf32>
    %228 = vector.extract_strided_slice %224 {offsets = [0, 96], sizes = [8, 32], strides = [1, 1]} : vector<8x128xf32> to vector<8x32xf32>
    %229 = arith.mulf %226, %204 : vector<8x32xf32>
    %230 = arith.mulf %225, %227 : vector<8x32xf32>
    %231 = arith.addf %229, %230 : vector<8x32xf32>
    %232 = math.tanh %231 : vector<8x32xf32>
    %233 = arith.mulf %228, %232 : vector<8x32xf32>
    %c0_68 = arith.constant 0 : index
    %234 = arith.index_cast %212 : i32 to index
    %c0_69 = arith.constant 0 : index
    %c0_70 = arith.constant 0 : index
    %235 = vector.load %arg4[%c0_68, %234, %c0_69, %c0_70] : memref<1x8x8x32xf32, #tpu.memory_space<vmem>>, vector<1x1x8x32xf32>
    %236 = vector.shape_cast %235 : vector<1x1x8x32xf32> to vector<8x32xf32>
    %237 = vector.shape_cast %233 : vector<8x32xf32> to vector<1x1x8x32xf32>
    tpu.vector_store %arg4[%c0_68, %234, %c0_69, %c0_70], %237 {strides = array<i32>} : memref<1x8x8x32xf32, #tpu.memory_space<vmem>>, vector<1x1x8x32xf32>,
    %c8_i32 = arith.constant 8 : i32
    %c0_71 = arith.constant 0 : index
    %c0_72 = arith.constant 0 : index
    %238 = vector.load %arg5[%c0_71, %c0_72] : memref<8x32xf32, #tpu.memory_space<vmem>>, vector<8x32xf32>
    tpu.vector_store %arg5[%c0_71, %c0_72], %233 {strides = array<i32>} : memref<8x32xf32, #tpu.memory_space<vmem>>, vector<8x32xf32>,
    %c0_73 = arith.constant 0 : index
    %c0_74 = arith.constant 0 : index
    %239 = vector.load %arg6[%c0_73, %c0_74] : memref<8x32xf32, #tpu.memory_space<vmem>>, vector<8x32xf32>
    tpu.vector_store %arg6[%c0_73, %c0_74], %231 {strides = array<i32>} : memref<8x32xf32, #tpu.memory_space<vmem>>, vector<8x32xf32>,
    return
  }
  func.func @transform_0(%arg0: i32, %arg1: i32) -> (i32, i32, i32, i32) {
    %c2_i32 = arith.constant 2 : i32
    %0 = arith.muli %c2_i32, %arg1 : i32
    %c0_i32 = arith.constant 0 : i32
    %1 = arith.subi %c0_i32, %0 : i32
    %2 = arith.muli %arg0, %1 : i32
    %3 = arith.addi %arg1, %2 : i32
    %c0_i32_0 = arith.constant 0 : i32
    %c0_i32_1 = arith.constant 0 : i32
    %c0_i32_2 = arith.constant 0 : i32
    return %arg0, %3, %c0_i32_0, %c0_i32_1 : i32, i32, i32, i32
  }
  func.func @transform_1(%arg0: i32, %arg1: i32) -> (i32, i32, i32) {
    %c0_i32 = arith.constant 0 : i32
    %c0_i32_0 = arith.constant 0 : i32
    %c0_i32_1 = arith.constant 0 : i32
    return %arg0, %c0_i32, %c0_i32_0 : i32, i32, i32
  }
  func.func @transform_2(%arg0: i32, %arg1: i32) -> (i32, i32, i32, i32) {
    %c2_i32 = arith.constant 2 : i32
    %0 = arith.muli %c2_i32, %arg1 : i32
    %c0_i32 = arith.constant 0 : i32
    %1 = arith.subi %c0_i32, %0 : i32
    %2 = arith.muli %arg0, %1 : i32
    %3 = arith.addi %arg1, %2 : i32
    %c0_i32_0 = arith.constant 0 : i32
    %c0_i32_1 = arith.constant 0 : i32
    %c0_i32_2 = arith.constant 0 : i32
    return %arg0, %3, %c0_i32_0, %c0_i32_1 : i32, i32, i32, i32
  }
}

</mosaic_0001>

<bundles_post_ra>
// kernel: lstm_model_forward.2
= control target key start
LH: loop header
LB: loop body
LE: loop exit
PB: predicated region body
PF: predicated region fallthrough
CT: control target
= control target key end

     0   :  { %s1611_s9 = smov 0   ;;  %s1613_s10 = smov 0   ;;  %s1845_s0 = inlined_call_operand.vmem [shape: f32[2,8,8,128], index: 0, kind: input, shape index: {}]   ;;  %s1846_s1 = inlined_call_operand.vmem [shape: f32[2,32,128], index: 1, kind: input, shape index: {}]   ;;  %s1847_s2 = inlined_call_operand.vmem [shape: f32[2,8,8,32], index: 2, kind: output, shape index: {}]  }
   0x1   :  { %s1615_s11 = smov 0  }
   0x2 LB: > { %s24_s12 = sadd.s32 1, %s1583_s10  ;;  %p1296_p0 = scmp.ge.s32.totalorder %s1587_s11, 1  ;;  %s1587_s11 = sphi %s1615_s11, %s12_s11   ;;  %s1583_s10 = sphi %s1613_s10, %s1849_s10   ;;  %s1579_s9 = sphi %s1611_s9, %s1848_s9  }
   0x3   : > { %p26_p1 = scmp.ge.s32.totalorder %s24_s12, 2  ;;  %p167_p2 = scmp.lt.s32.totalorder %s1587_s11, 3 }
   0x5   : > { %s1851_s12 = smov (%p26_p1, %s24_s12), 0  ;;  %p168_p3 = pnand %p1296_p0, %p167_p2 }
   0x6   : > { %p215_p4 = scmp.lt.s32.totalorder (!%p168_p3), %s1579_s9, 1  ;;  %vm256_vm0 = vcmask (!%p168_p3), 261120   ;;  %v1589_v0 = vmov (!%p168_p3), 0.0|0.0   ;;  %vm1590_vm1 = vmmov (!%p168_p3), 0   ;;  %v1591_v1 = vmov (!%p168_p3), 0.0   ;;  %p251_p5 = scmp.eq.s32.totalorder (!%p168_p3), %s1579_s9, 1 }
   0x7   : > { %171 = sbr.rel (%p168_p3) target bundleno = 5693 (0x163d), region = 28  ;;  %1454 = vmatprep.subr.bf16.mxu0 (!%p168_p3), %v1589_v0  ;;  %1374 = vmatprep.mubr.msk.f32.mxu0 (!%p168_p3), %vm1590_vm1, %v1591_v1  ;;  %257 = vst.msk [vmem:[#allocation2] sm:$0xff] (!%p168_p3), %vm256_vm0, %v1591_v1  ;;  %258 = vst.msk [vmem:[#allocation3] sm:$0xff] (!%p168_p3), %vm256_vm0, %v1591_v1  ;;  %v263_v9 = vlaneseq (!%p168_p3)  ;;  %v1592_v12 = vmov (!%p168_p3), 0.5   ;;  %s1593_s25 = smov (!%p168_p3), 64  }
   0x8   : > { %1460 = vmatprep.subr.bf16.mxu1 (!%p168_p3), %v1589_v0  ;;  %1385 = vmatprep.mubr.msk.f32.mxu1 (!%p168_p3), %vm1590_vm1, %v1591_v1  ;;  %s1594_s26 = smov (!%p168_p3), 32  }
   0x9   : > { %v264_v10 = vand.u32 (!%p168_p3), 127, %v263_v9 }
   0xb   : > { %vm265_vm2 = vcmp.ge.s32.totalorder (!%p168_p3), %v264_v10, 64  ;;  %vm266_vm3 = vcmp.lt.s32.totalorder (!%p168_p3), %v264_v10, 96 }
   0xc   : > { %vm267_vm4 = vmand (!%p168_p3), %vm265_vm2, %vm266_vm3 }
   0xd   : > { %v1685_v13 = vsel (!%p168_p3), %vm267_vm4, 1.0, %v1592_v12  ;;  %v1688_v19 = vsel (!%p168_p3), %vm267_vm4, 0.0, %v1592_v12 }
   0xe   : > { %s1640_s13 = scalar_select %p215_p4, %s1579_s9, 1  ;;  %v272_v8 = vld [vmem:[#allocation2] sm:$0xff]  ;;  %v273_v22 = vld [vmem:[#allocation3] sm:$0xff] }
   0xf   : > { %s1671_s18 = scalar_select %p251_p5, 7, 0 }
  0x10   : > { %s1324_s14 = sshll.u32 %s1640_s13, 5  ;;  %s1323_s19 = sshll.u32 %s1640_s13, 6 }
  0x11   : > { %s232_s17 = scalar_lea.vmem %s1846_s1, %s1324_s14  ;;  %s1679_s22 = scalar_lea.vmem %s1845_s0, %s1323_s19 }
  0x12   : > { %v259_v2 = vld [vmem:[%s232_s17] sm:$0xff]  ;;  %v260_v3 = vld [vmem:[%s232_s17 + $0x8] sm:$0xff]  ;;  %v261_v4 = vld [vmem:[%s232_s17 + $0x10] sm:$0xff]  ;;  %s1303_s23 = sshll.u32 %s1671_s18, 3  ;;  %s1702_s29 = scalar_lea.vmem %s1847_s2, %s1323_s19 }
  0x13   : > { %v1649_v5 = vpack.c.bf16 %v260_v3, %v259_v2  ;;  %v262_v6 = vld [vmem:[%s232_s17 + $0x18] sm:$0xff]  ;;  %s275_s24 = scalar_lea.vmem %s1679_s22, %s1303_s23  ;;  %s381_s30 = scalar_lea.vmem %s1702_s29, %s1303_s23 }
  0x14   : > { %v1652_v7 = vpack.c.bf16 %v262_v6, %v261_v4  ;;  %v276_v11 = vld [vmem:[%s275_s24] sm:$0xff]  ;;  %s1717_s3 = scalar_select %p251_p5, 4294967295, 1 }
  0x15   : > { %1456 = vmatpush3.bf16.msra.mxu0 %v1649_v5  ;;  %1462 = vmatpush3.bf16.msra.mxu1 %v1649_v5 }
  0x16   : > { %1457 = vmatprep.subr.bf16.mxu0 %v1589_v0  ;;  %1463 = vmatprep.subr.bf16.mxu1 %v1589_v0  ;;  %s383_s4 = sadd.s32 %s1717_s3, %s1671_s18  ;;  %s1307_s8 = sshll.u32 %s1717_s3, 1 }
  0x17   : > { %s1305_s5 = sshll.u32 %s383_s4, 3  ;;  %s488_s9 = sadd.s32 %s1307_s8, %s1671_s18 }
  0x18   : > { %s385_s6 = scalar_lea.vmem %s1679_s22, %s1305_s5  ;;  %s485_s7 = scalar_lea.vmem %s1702_s29, %s1305_s5 }
  0x19   : > { %1459 = vmatpush3.bf16.msra.mxu0 %v1652_v7  ;;  %1465 = vmatpush3.bf16.msra.mxu1 %v1652_v7  ;;  %v386_v33 = vld [vmem:[%s385_s6] sm:$0xff]  ;;  %s1308_s13 = sshll.u32 %s488_s9, 3  ;;  %s592_s16 = smul.u32 3, %s1717_s3 }
  0x1a   : > { %1466 = vmatprep.subr.bf16.mxu0 %v1589_v0  ;;  %1472 = vmatprep.subr.bf16.mxu1 %v1589_v0  ;;  %s490_s14 = scalar_lea.vmem %s1679_s22, %s1308_s13  ;;  %s590_s15 = scalar_lea.vmem %s1702_s29, %s1308_s13 }
  0x1b   : > { %v491_v50 = vld [vmem:[%s490_s14] sm:$0xff]  ;;  %s593_s17 = sadd.s32 %s592_s16, %s1671_s18  ;;  %s1312_s23 = sshll.u32 %s1717_s3, 2 }
  0x1c   : > { %1375 = vmatmul.mubr.msk.f32.vlgmr.msra.gmra.mrb[0].mxu0 %vm256_vm0, %v272_v8  ;;  %s1310_s19 = sshll.u32 %s593_s17, 3  ;;  %s698_s24 = sadd.s32 %s1312_s23, %s1671_s18 }
  0x1d   : > { %1468 = vmatpush3.bf16.msra.mxu0 %v1649_v5  ;;  %1396 = vmatprep.mubr.msk.f32.mxu0 %vm1590_vm1, %v1591_v1  ;;  %s595_s20 = scalar_lea.vmem %s1679_s22, %s1310_s19  ;;  %s695_s21 = scalar_lea.vmem %s1702_s29, %s1310_s19 }
  0x1e   : > { %1469 = vmatprep.subr.bf16.mxu0 %v1589_v0  ;;  %v596_v6 = vld [vmem:[%s595_s20] sm:$0xff]  ;;  %s1313_s27 = sshll.u32 %s698_s24, 3  ;;  %s802_s4 = smul.u32 5, %s1717_s3 }
  0x1f   : > { %s700_s28 = scalar_lea.vmem %s1679_s22, %s1313_s27  ;;  %s907_s9 = smul.u32 6, %s1717_s3 }
  0x20   : > { %s803_s5 = sadd.s32 %s802_s4, %s1671_s18  ;;  %s1012_s17 = smul.u32 7, %s1717_s3 }
  0x21   : > { %1471 = vmatpush3.bf16.msra.mxu0 %v1652_v7  ;;  %s1315_s6 = sshll.u32 %s803_s5, 3  ;;  %s908_s13 = sadd.s32 %s907_s9, %s1671_s18 }
  0x22   : > { %1478 = vmatprep.subr.bf16.mxu0 %v1589_v0  ;;  %s905_s8 = scalar_lea.vmem %s1702_s29, %s1315_s6  ;;  %s1317_s14 = sshll.u32 %s908_s13, 3 }
  0x23   : > { %s1010_s16 = scalar_lea.vmem %s1702_s29, %s1317_s14  ;;  %s1821_s19 = sadd.s32 %s1012_s17, %s1671_s18 }
  0x24   : > { %s1319_s20 = sshll.u32 %s1821_s19, 3  ;;  %s1595_s18 = smov 96  }
  0xef   : > { %v347_v14 = vpop.f32.mrb[0].mxu0 }
  0xf0   : > { %v351_v15 = vadd.f32 %v347_v14, %v276_v11  ;;  %v1376_v16 = vpop.f32.mrb[1].mxu0 }
  0xf2   : > { %v352_v17 = vmul.f32 %v351_v15, %v1685_v13 }
  0xf4   : > { %1533 = vtanh.f32 %v352_v17 }
  0xfe   : > { %v1534_v18 = vpop.eup %1533 }
  0xff   : > { %v354_v20 = vmul.f32 %v1534_v18, %v1685_v13 }
 0x101   : > { %v355_v21 = vadd.f32 %v354_v20, %v1688_v19 }
 0x103   : > { %362 = vrot.lane.b32.xlu0 %v355_v21, %s1593_s25 }
 0x107   : > { %357 = vrot.lane.b32.xlu0 %v273_v22, %s1594_s26 }
 0x175   : > { %v363_v23 = vpop.permute.xlu0 %362 }
 0x176   : > { %v365_v24 = vmul.f32 %v363_v23, %v355_v21 }
 0x178   : > { %367 = vrot.lane.b32.xlu1 %v365_v24, %s1594_s26 }
 0x179   : > { %v358_v25 = vpop.permute.xlu0 %357 }
 0x17a   : > { %v360_v26 = vmul.f32 %v358_v25, %v355_v21 }
 0x1ea   : > { %v368_v27 = vpop.permute.xlu1 %367 }
 0x1eb   : > { %v370_v28 = vadd.f32 %v368_v27, %v360_v26  ;;  %v701_v26 = vld [vmem:[%s700_s28] sm:$0xff] }
 0x1ed   : > { %1535 = vtanh.f32 %v370_v28 }
 0x1f7   : > { %v1536_v29 = vpop.eup %1535 }
 0x1f8   : > { %373 = vrot.lane.b32.xlu1 %v1536_v29, %s1593_s25 }
 0x26a   : > { %v374_v30 = vpop.permute.xlu1 %373 }
 0x26b   : > { %v376_v31 = vmul.f32 %v374_v30, %v355_v21 }
 0x26d   : > { %378 = vrot.lane.b32.xlu0 %v376_v31, %s1594_s26 }
 0x2df   : > { %v379_v32 = vpop.permute.xlu0 %378 }
 0x2e0   : > { %382 = vst.msk [vmem:[%s381_s30] sm:$0xff] %vm256_vm0, %v379_v32  ;;  %1386 = vmatmul.mubr.msk.f32.vlgmr.msra.gmra.mrb[0].mxu1 %vm256_vm0, %v379_v32  ;;  %s800_s30 = scalar_lea.vmem %s1702_s29, %s1313_s27 }
 0x2e1   : > { %1474 = vmatpush3.bf16.msra.mxu1 %v1649_v5  ;;  %1407 = vmatprep.mubr.msk.f32.mxu1 %vm1590_vm1, %v1591_v1 }
 0x2e2   : > { %1475 = vmatprep.subr.bf16.mxu1 %v1589_v0 }
 0x2e5   : > { %1477 = vmatpush3.bf16.msra.mxu1 %v1652_v7 }
 0x2e6   : > { %1484 = vmatprep.subr.bf16.mxu1 %v1589_v0 }
 0x3b3   : > { %v455_v34 = vpop.f32.mrb[0].mxu1 }
 0x3b4   : > { %v459_v35 = vadd.f32 %v455_v34, %v386_v33  ;;  %v1387_v36 = vpop.f32.mrb[1].mxu1 }
 0x3b6   : > { %v460_v37 = vmul.f32 %v459_v35, %v1685_v13 }
 0x3b8   : > { %1537 = vtanh.f32 %v460_v37 }
 0x3c2   : > { %v1538_v38 = vpop.eup %1537 }
 0x3c3   : > { %v462_v39 = vmul.f32 %v1538_v38, %v1685_v13 }
 0x3c5   : > { %v463_v40 = vadd.f32 %v462_v39, %v1688_v19 }
 0x3c7   : > { %466 = vrot.lane.b32.xlu1 %v463_v40, %s1593_s25  ;;  %v464_v43 = vmul.f32 %v463_v40, %v370_v28 }
 0x439   : > { %v467_v41 = vpop.permute.xlu1 %466 }
 0x43a   : > { %v469_v42 = vmul.f32 %v467_v41, %v463_v40 }
 0x43c   : > { %471 = vrot.lane.b32.xlu0 %v469_v42, %s1594_s26 }
 0x4ae   : > { %v472_v44 = vpop.permute.xlu0 %471 }
 0x4af   : > { %v474_v45 = vadd.f32 %v472_v44, %v464_v43 }
 0x4b1   : > { %1539 = vtanh.f32 %v474_v45 }
 0x4bb   : > { %v1540_v46 = vpop.eup %1539 }
 0x4bc   : > { %477 = vrot.lane.b32.xlu1 %v1540_v46, %s1593_s25 }
 0x52e   : > { %v478_v47 = vpop.permute.xlu1 %477 }
 0x52f   : > { %v480_v48 = vmul.f32 %v478_v47, %v463_v40 }
 0x531   : > { %482 = vrot.lane.b32.xlu0 %v480_v48, %s1594_s26 }
 0x5a3   : > { %v483_v49 = vpop.permute.xlu0 %482 }
 0x5a4   : > { %486 = vst.msk [vmem:[%s485_s7] sm:$0xff] %vm256_vm0, %v483_v49  ;;  %1397 = vmatmul.mubr.msk.f32.vlgmr.msra.gmra.mrb[2].mxu0 %vm256_vm0, %v483_v49  ;;  %s805_s7 = scalar_lea.vmem %s1679_s22, %s1315_s6 }
 0x5a5   : > { %1480 = vmatpush3.bf16.msra.mxu0 %v1649_v5  ;;  %1418 = vmatprep.mubr.msk.f32.mxu0 %vm1590_vm1, %v1591_v1  ;;  %v806_v43 = vld [vmem:[%s805_s7] sm:$0xff] }
 0x5a6   : > { %1481 = vmatprep.subr.bf16.mxu0 %v1589_v0 }
 0x5a9   : > { %1483 = vmatpush3.bf16.msra.mxu0 %v1652_v7 }
 0x5aa   : > { %1490 = vmatprep.subr.bf16.mxu0 %v1589_v0 }
 0x677   : > { %v560_v51 = vpop.f32.mrb[2].mxu0 }
 0x678   : > { %v564_v52 = vadd.f32 %v560_v51, %v491_v50  ;;  %v1398_v53 = vpop.f32.mrb[3].mxu0 }
 0x67a   : > { %v565_v54 = vmul.f32 %v564_v52, %v1685_v13 }
 0x67c   : > { %1541 = vtanh.f32 %v565_v54 }
 0x686   : > { %v1542_v55 = vpop.eup %1541 }
 0x687   : > { %v567_v56 = vmul.f32 %v1542_v55, %v1685_v13 }
 0x689   : > { %v568_v57 = vadd.f32 %v567_v56, %v1688_v19 }
 0x68b   : > { %571 = vrot.lane.b32.xlu1 %v568_v57, %s1593_s25  ;;  %v569_v60 = vmul.f32 %v568_v57, %v474_v45 }
 0x6fd   : > { %v572_v58 = vpop.permute.xlu1 %571 }
 0x6fe   : > { %v574_v59 = vmul.f32 %v572_v58, %v568_v57 }
 0x700   : > { %576 = vrot.lane.b32.xlu0 %v574_v59, %s1594_s26 }
 0x772   : > { %v577_v61 = vpop.permute.xlu0 %576 }
 0x773   : > { %v579_v62 = vadd.f32 %v577_v61, %v569_v60 }
 0x775   : > { %1543 = vtanh.f32 %v579_v62 }
 0x77f   : > { %v1544_v63 = vpop.eup %1543 }
 0x780   : > { %582 = vrot.lane.b32.xlu1 %v1544_v63, %s1593_s25 }
 0x7f2   : > { %v583_v2 = vpop.permute.xlu1 %582 }
 0x7f3   : > { %v585_v3 = vmul.f32 %v583_v2, %v568_v57 }
 0x7f5   : > { %587 = vrot.lane.b32.xlu0 %v585_v3, %s1594_s26 }
 0x867   : > { %v588_v4 = vpop.permute.xlu0 %587 }
 0x868   : > { %591 = vst.msk [vmem:[%s590_s15] sm:$0xff] %vm256_vm0, %v588_v4  ;;  %1408 = vmatmul.mubr.msk.f32.vlgmr.msra.gmra.mrb[2].mxu1 %vm256_vm0, %v588_v4  ;;  %s910_s15 = scalar_lea.vmem %s1679_s22, %s1317_s14 }
 0x869   : > { %1486 = vmatpush3.bf16.msra.mxu1 %v1649_v5  ;;  %1429 = vmatprep.mubr.msk.f32.mxu1 %vm1590_vm1, %v1591_v1  ;;  %v911_v56 = vld [vmem:[%s910_s15] sm:$0xff] }
 0x86a   : > { %1487 = vmatprep.subr.bf16.mxu1 %v1589_v0 }
 0x86d   : > { %1489 = vmatpush3.bf16.msra.mxu1 %v1652_v7 }
 0x86e   : > { %1496 = vmatprep.subr.bf16.mxu1 %v1589_v0 }
 0x93b   : > { %v665_v8 = vpop.f32.mrb[2].mxu1 }
 0x93c   : > { %v669_v9 = vadd.f32 %v665_v8, %v596_v6  ;;  %v1409_v10 = vpop.f32.mrb[3].mxu1 }
 0x93e   : > { %v670_v11 = vmul.f32 %v669_v9, %v1685_v13 }
 0x940   : > { %1545 = vtanh.f32 %v670_v11 }
 0x94a   : > { %v1546_v12 = vpop.eup %1545 }
 0x94b   : > { %v672_v14 = vmul.f32 %v1546_v12, %v1685_v13 }
 0x94d   : > { %v673_v15 = vadd.f32 %v672_v14, %v1688_v19 }
 0x94f   : > { %676 = vrot.lane.b32.xlu1 %v673_v15, %s1593_s25  ;;  %v674_v18 = vmul.f32 %v673_v15, %v579_v62 }
 0x9c1   : > { %v677_v16 = vpop.permute.xlu1 %676 }
 0x9c2   : > { %v679_v17 = vmul.f32 %v677_v16, %v673_v15 }
 0x9c4   : > { %681 = vrot.lane.b32.xlu0 %v679_v17, %s1594_s26 }
 0xa36   : > { %v682_v20 = vpop.permute.xlu0 %681 }
 0xa37   : > { %v684_v21 = vadd.f32 %v682_v20, %v674_v18 }
 0xa39   : > { %1547 = vtanh.f32 %v684_v21 }
 0xa43   : > { %v1548_v22 = vpop.eup %1547 }
 0xa44   : > { %687 = vrot.lane.b32.xlu1 %v1548_v22, %s1593_s25 }
 0xab6   : > { %v688_v23 = vpop.permute.xlu1 %687 }
 0xab7   : > { %v690_v24 = vmul.f32 %v688_v23, %v673_v15 }
 0xab9   : > { %692 = vrot.lane.b32.xlu0 %v690_v24, %s1594_s26 }
 0xb2b   : > { %v693_v25 = vpop.permute.xlu0 %692 }
 0xb2c   : > { %696 = vst.msk [vmem:[%s695_s21] sm:$0xff] %vm256_vm0, %v693_v25  ;;  %1419 = vmatmul.mubr.msk.f32.vlgmr.msra.gmra.mrb[4].mxu0 %vm256_vm0, %v693_v25  ;;  %s1015_s21 = scalar_lea.vmem %s1679_s22, %s1319_s20  ;;  %s1115_s22 = scalar_lea.vmem %s1702_s29, %s1319_s20 }
 0xb2d   : > { %1492 = vmatpush3.bf16.msra.mxu0 %v1649_v5  ;;  %1440 = vmatprep.mubr.msk.f32.mxu0 %vm1590_vm1, %v1591_v1  ;;  %v1016_v14 = vld [vmem:[%s1015_s21] sm:$0xff] }
 0xb2e   : > { %1493 = vmatprep.subr.bf16.mxu0 %v1589_v0 }
 0xb31   : > { %1495 = vmatpush3.bf16.msra.mxu0 %v1652_v7 }
 0xbff   : > { %v770_v27 = vpop.f32.mrb[4].mxu0 }
 0xc00   : > { %v774_v28 = vadd.f32 %v770_v27, %v701_v26  ;;  %v1420_v29 = vpop.f32.mrb[5].mxu0 }
 0xc02   : > { %v775_v30 = vmul.f32 %v774_v28, %v1685_v13 }
 0xc04   : > { %1549 = vtanh.f32 %v775_v30 }
 0xc0e   : > { %v1550_v31 = vpop.eup %1549 }
 0xc0f   : > { %v777_v32 = vmul.f32 %v1550_v31, %v1685_v13 }
 0xc11   : > { %v778_v33 = vadd.f32 %v777_v32, %v1688_v19 }
 0xc13   : > { %781 = vrot.lane.b32.xlu1 %v778_v33, %s1593_s25  ;;  %v779_v36 = vmul.f32 %v778_v33, %v684_v21 }
 0xc85   : > { %v782_v34 = vpop.permute.xlu1 %781 }
 0xc86   : > { %v784_v35 = vmul.f32 %v782_v34, %v778_v33 }
 0xc88   : > { %786 = vrot.lane.b32.xlu0 %v784_v35, %s1594_s26 }
 0xcfa   : > { %v787_v37 = vpop.permute.xlu0 %786 }
 0xcfb   : > { %v789_v38 = vadd.f32 %v787_v37, %v779_v36 }
 0xcfd   : > { %1551 = vtanh.f32 %v789_v38 }
 0xd07   : > { %v1552_v39 = vpop.eup %1551 }
 0xd08   : > { %792 = vrot.lane.b32.xlu1 %v1552_v39, %s1593_s25 }
 0xd7a   : > { %v793_v40 = vpop.permute.xlu1 %792 }
 0xd7b   : > { %v795_v41 = vmul.f32 %v793_v40, %v778_v33 }
 0xd7d   : > { %797 = vrot.lane.b32.xlu0 %v795_v41, %s1594_s26 }
 0xdef   : > { %v798_v42 = vpop.permute.xlu0 %797 }
 0xdf0   : > { %801 = vst.msk [vmem:[%s800_s30] sm:$0xff] %vm256_vm0, %v798_v42  ;;  %1430 = vmatmul.mubr.msk.f32.vlgmr.msra.gmra.mrb[4].mxu1 %vm256_vm0, %v798_v42 }
 0xdf1   : > { %1498 = vmatpush3.bf16.msra.mxu1 %v1649_v5  ;;  %1451 = vmatprep.mubr.msk.f32.mxu1 %vm1590_vm1, %v1591_v1 }
 0xdf2   : > { %1499 = vmatprep.subr.bf16.mxu1 %v1589_v0 }
 0xdf5   : > { %1501 = vmatpush3.bf16.msra.mxu1 %v1652_v7 }
 0xec3   : > { %v875_v44 = vpop.f32.mrb[4].mxu1 }
 0xec4   : > { %v879_v45 = vadd.f32 %v875_v44, %v806_v43  ;;  %v1431_v46 = vpop.f32.mrb[5].mxu1 }
 0xec6   : > { %v880_v47 = vmul.f32 %v879_v45, %v1685_v13 }
 0xec8   : > { %1553 = vtanh.f32 %v880_v47 }
 0xed2   : > { %v1554_v48 = vpop.eup %1553 }
 0xed3   : > { %v882_v5 = vmul.f32 %v1554_v48, %v1685_v13 }
 0xed5   : > { %v883_v1 = vadd.f32 %v882_v5, %v1688_v19 }
 0xed7   : > { %886 = vrot.lane.b32.xlu1 %v883_v1, %s1593_s25  ;;  %v884_v49 = vmul.f32 %v883_v1, %v789_v38 }
 0xf49   : > { %v887_v0 = vpop.permute.xlu1 %886 }
 0xf4a   : > { %v889_v7 = vmul.f32 %v887_v0, %v883_v1 }
 0xf4c   : > { %891 = vrot.lane.b32.xlu0 %v889_v7, %s1594_s26 }
 0xfbe   : > { %v892_v50 = vpop.permute.xlu0 %891 }
 0xfbf   : > { %v894_v51 = vadd.f32 %v892_v50, %v884_v49 }
 0xfc1   : > { %1555 = vtanh.f32 %v894_v51 }
 0xfcb   : > { %v1556_v52 = vpop.eup %1555 }
 0xfcc   : > { %897 = vrot.lane.b32.xlu1 %v1556_v52, %s1593_s25 }
0x103e   : > { %v898_v53 = vpop.permute.xlu1 %897 }
0x103f   : > { %v900_v54 = vmul.f32 %v898_v53, %v883_v1 }
0x1041   : > { %902 = vrot.lane.b32.xlu0 %v900_v54, %s1594_s26 }
0x10b3   : > { %v903_v55 = vpop.permute.xlu0 %902 }
0x10b4   : > { %906 = vst.msk [vmem:[%s905_s8] sm:$0xff] %vm256_vm0, %v903_v55  ;;  %1441 = vmatmul.mubr.msk.f32.vlgmr.msra.gmra.mrb[6].mxu0 %vm256_vm0, %v903_v55 }
0x1187   : > { %v980_v57 = vpop.f32.mrb[6].mxu0 }
0x1188   : > { %v984_v58 = vadd.f32 %v980_v57, %v911_v56  ;;  %v1442_v59 = vpop.f32.mrb[7].mxu0 }
0x118a   : > { %v985_v60 = vmul.f32 %v984_v58, %v1685_v13 }
0x118c   : > { %1557 = vtanh.f32 %v985_v60 }
0x1196   : > { %v1558_v61 = vpop.eup %1557 }
0x1197   : > { %v987_v62 = vmul.f32 %v1558_v61, %v1685_v13 }
0x1199   : > { %v988_v63 = vadd.f32 %v987_v62, %v1688_v19 }
0x119b   : > { %991 = vrot.lane.b32.xlu1 %v988_v63, %s1593_s25  ;;  %v989_v4 = vmul.f32 %v988_v63, %v894_v51 }
0x120d   : > { %v992_v2 = vpop.permute.xlu1 %991 }
0x120e   : > { %v994_v3 = vmul.f32 %v992_v2, %v988_v63 }
0x1210   : > { %996 = vrot.lane.b32.xlu0 %v994_v3, %s1594_s26 }
0x1282   : > { %v997_v6 = vpop.permute.xlu0 %996 }
0x1283   : > { %v999_v8 = vadd.f32 %v997_v6, %v989_v4 }
0x1285   : > { %1559 = vtanh.f32 %v999_v8 }
0x128f   : > { %v1560_v9 = vpop.eup %1559 }
0x1290   : > { %1002 = vrot.lane.b32.xlu1 %v1560_v9, %s1593_s25 }
0x1302   : > { %v1003_v10 = vpop.permute.xlu1 %1002 }
0x1303   : > { %v1005_v11 = vmul.f32 %v1003_v10, %v988_v63 }
0x1305   : > { %1007 = vrot.lane.b32.xlu0 %v1005_v11, %s1594_s26 }
0x1377   : > { %v1008_v12 = vpop.permute.xlu0 %1007 }
0x1378   : > { %1011 = vst.msk [vmem:[%s1010_s16] sm:$0xff] %vm256_vm0, %v1008_v12  ;;  %1452 = vmatmul.mubr.msk.f32.vlgmr.msra.gmra.mrb[6].mxu1 %vm256_vm0, %v1008_v12 }
0x144b   : > { %v1085_v15 = vpop.f32.mrb[6].mxu1 }
0x144c   : > { %v1089_v16 = vadd.f32 %v1085_v15, %v1016_v14  ;;  %v1453_v17 = vpop.f32.mrb[7].mxu1 }
0x144e   : > { %v1090_v18 = vmul.f32 %v1089_v16, %v1685_v13 }
0x1450   : > { %1561 = vtanh.f32 %v1090_v18 }
0x145a   : > { %v1562_v20 = vpop.eup %1561 }
0x145b   : > { %v1092_v21 = vmul.f32 %v1562_v20, %v1685_v13 }
0x145d   : > { %v1093_v22 = vadd.f32 %v1092_v21, %v1688_v19 }
0x145f   : > { %1096 = vrot.lane.b32.xlu1 %v1093_v22, %s1593_s25  ;;  %v1094_v25 = vmul.f32 %v1093_v22, %v999_v8 }
0x14d1   : > { %v1097_v23 = vpop.permute.xlu1 %1096 }
0x14d2   : > { %v1099_v24 = vmul.f32 %v1097_v23, %v1093_v22 }
0x14d4   : > { %1101 = vrot.lane.b32.xlu0 %v1099_v24, %s1594_s26 }
0x1546   : > { %v1102_v26 = vpop.permute.xlu0 %1101 }
0x1547   : > { %v1104_v27 = vadd.f32 %v1102_v26, %v1094_v25 }
0x1549   : > { %1563 = vtanh.f32 %v1104_v27 }
0x1553   : > { %v1564_v28 = vpop.eup %1563 }
0x1554   : > { %1107 = vrot.lane.b32.xlu1 %v1564_v28, %s1593_s25 }
0x1558   : > { %1119 = vrot.lane.b32.xlu1 %v1104_v27, %s1595_s18 }
0x15c6   : > { %v1108_v29 = vpop.permute.xlu1 %1107 }
0x15c7   : > { %v1110_v13 = vmul.f32 %v1108_v29, %v1093_v22 }
0x15c9   : > { %1112 = vrot.lane.b32.xlu0 %v1110_v13, %s1594_s26 }
0x15ca   : > { %v1120_v19 = vpop.permute.xlu1 %1119 }
0x15cb   : > { %1122 = vst.msk [vmem:[#allocation3] sm:$0xff] %vm256_vm0, %v1120_v19 }
0x163b   : > { %v1113_v30 = vpop.permute.xlu0 %1112 }
0x163c   : > { %1116 = vst.msk [vmem:[%s1115_s22] sm:$0xff] %vm256_vm0, %v1113_v30  ;;  %1117 = vst.msk [vmem:[#allocation2] sm:$0xff] %vm256_vm0, %v1113_v30 }
0x163d PF: > { %s12_s11 = sadd.s32 1, %s1587_s11   ;;  %s1848_s9 = smov %s1583_s10 }
0x163e   : > { %p9_p6 = scmp.ge.s32.totalorder %s12_s11, 4   ;;  %s1849_s10 = smov %s1851_s12 }
0x1640   :  { %11 = sbr.rel (!%p9_p6) target bundleno = 2 (0x2), region = 81 }

</bundles_post_ra>
